<compile_context>
chip_gen: v6e
topology: v6e:2x2x1
jax: 0.10.0
libtpu: 0.0.40
codegen_flags: <defaults>
</compile_context>

<pallas_src>
import functools

import jax
import jax.numpy as jnp
from jax import lax
from jax.experimental import pallas as pl
from jax.experimental.pallas import tpu as pltpu

LANE = 128          # TPU lane width; weight columns are zero-padded to this
OUT_LANES = 128     # lane-dense output width for the tiny per-row outputs
PAD_BIAS = -1e30    # bias of padded classifier columns (never wins argmax/softmax)


# ----------------------------------------------------------------------------
# small helpers
# ----------------------------------------------------------------------------
def _round_up(n, m):
    return ((n + m - 1) // m) * m


def _pad2d(x, rows, cols, fill=0.0):
    pr, pc = rows - x.shape[0], cols - x.shape[1]
    if pr == 0 and pc == 0:
        return x
    return jnp.pad(x, ((0, pr), (0, pc)), constant_values=fill)


def _sigmoid(x):
    # numerically stable logistic: 0.5 * (tanh(x/2) + 1)
    return 0.5 * (jnp.tanh(0.5 * x) + 1.0)


def _softmax_lastdim(y):
    m = jnp.max(y, axis=-1, keepdims=True)
    e = jnp.exp(y - m)
    return e / jnp.sum(e, axis=-1, keepdims=True)


def _argmax_lastdim(y):
    """First index attaining the row max (== torch.argmax), shape (rows, 1)."""
    m = jnp.max(y, axis=-1, keepdims=True)
    idx = lax.broadcasted_iota(jnp.int32, y.shape, y.ndim - 1)
    cand = jnp.where(y == m, idx, jnp.int32(y.shape[-1]))
    return jnp.min(cand, axis=-1, keepdims=True)


def _graph_net_rows(ids, folded_ref, gb_ref, *, num_domains, num_entities):
    """graph_net with the frozen embedding pre-folded into its projection:
    one stacked multi-domain one-hot (exact in bf16) times the folded table,
    then bias + tanh.  Output: f32 [rows, D]."""
    rows = ids.shape[0]
    width = num_domains * num_entities
    iota = lax.broadcasted_iota(jnp.int32, (rows, width), 1)
    oh = (iota == ids[:, 0:1]).astype(jnp.float32)
    for j in range(1, num_domains):                      # num_domains is tiny
        oh = oh + (iota == (ids[:, j:j + 1] + j * num_entities)).astype(jnp.float32)
    emb = jnp.dot(oh.astype(jnp.bfloat16), folded_ref[...],
                  preferred_element_type=jnp.float32)
    return jnp.tanh(emb + gb_ref[...])


# ----------------------------------------------------------------------------
# fused kernels
# ----------------------------------------------------------------------------
def _pair_kernel(ids_ref, folded_ref, gb_ref,
                 w1_ref, b1_ref, w2_ref, b2_ref, w3_ref, b3_ref,
                 wa_ref, ba_ref, *rest, with_pred1, with_pred2):
    """Two-record modes ('g', 'f_ll', 'f_ul', 'f_uu').

    ids_ref holds a per-tile stack [x1 rows ; x2 rows] so graph_net and the
    shared gam encoder run once per tile on 2*T rows."""
    want_clf = with_pred1 or with_pred2
    if want_clf:
        cw_ref, cb_ref, agree_ref, pred_ref = rest
    else:
        (agree_ref,) = rest

    rows, nd = ids_ref.shape
    T = rows // 2
    E = folded_ref.shape[0] // nd

    # graph_net on the stacked rows
    g = _graph_net_rows(ids_ref[...], folded_ref, gb_ref,
                        num_domains=nd, num_entities=E)            # (2T, D) f32
    g16 = g.astype(jnp.bfloat16)

    # shared gam encoder (bf16 operands, f32 accumulate, f32 tanh)
    h = jnp.tanh(jnp.dot(g16, w1_ref[...],
                         preferred_element_type=jnp.float32) + b1_ref[...])
    h = jnp.tanh(jnp.dot(h.astype(jnp.bfloat16), w2_ref[...],
                         preferred_element_type=jnp.float32) + b2_ref[...])
    h = jnp.tanh(jnp.dot(h.astype(jnp.bfloat16), w3_ref[...],
                         preferred_element_type=jnp.float32) + b3_ref[...])

    e1 = h[:T, :]
    e2 = h[T:, :]
    z = jnp.abs(e1 - e2)
    # agreement head: N=1 matmul replaced by VPU multiply + lane reduction
    s = jnp.sum(z * wa_ref[...], axis=-1, keepdims=True) + ba_ref[...]   # (T, 1)
    agree_ref[...] = jnp.broadcast_to(_sigmoid(s), (T, OUT_LANES))

    # classifier predictions: argmax on logits (softmax skipped)
    if want_clf:
        if with_pred2:
            logits = jnp.dot(g16, cw_ref[...],
                             preferred_element_type=jnp.float32) + cb_ref[...]
            p1 = _argmax_lastdim(logits[:T, :])
            p2 = _argmax_lastdim(logits[T:, :])
            lane = lax.broadcasted_iota(jnp.int32, (T, OUT_LANES), 1)
            pred_ref[...] = jnp.where(lane == 0, p1, p2)   # col0 = p1, col1 = p2
        else:
            logits1 = jnp.dot(g16[:T, :], cw_ref[...],
                              preferred_element_type=jnp.float32) + cb_ref[...]
            pred_ref[...] = jnp.broadcast_to(_argmax_lastdim(logits1),
                                             (T, OUT_LANES))


def _single_kernel(ids_ref, folded_ref, gb_ref, cw_ref, cb_ref, o_ref):
    """Single-record modes ('f' and test): graph_net -> Linear -> softmax."""
    _, nd = ids_ref.shape
    E = folded_ref.shape[0] // nd
    g = _graph_net_rows(ids_ref[...], folded_ref, gb_ref,
                        num_domains=nd, num_entities=E)
    logits = jnp.dot(g.astype(jnp.bfloat16), cw_ref[...],
                     preferred_element_type=jnp.float32) + cb_ref[...]
    o_ref[...] = _softmax_lastdim(logits)


# ----------------------------------------------------------------------------
# wrapper helpers
# ----------------------------------------------------------------------------
def _const_spec(shape):
    # weight block pinned to (0, 0): stays VMEM-resident across grid steps
    return pl.BlockSpec(shape, lambda i: (0,) * len(shape))


def _vmem_limit_bytes(weight_arrays, per_tile_bytes):
    wbytes = sum(int(a.size) * a.dtype.itemsize for a in weight_arrays)
    need = 2 * wbytes + per_tile_bytes + (4 << 20)
    return int(min(56 << 20, max(32 << 20, need)))


def _pad_batch_i32(x, rows_to):
    x = x.astype(jnp.int32)
    if rows_to == x.shape[0]:
        return x
    pad = jnp.zeros((rows_to - x.shape[0], x.shape[1]), jnp.int32)
    return jnp.concatenate([x, pad], axis=0)


# ----------------------------------------------------------------------------
# wrappers (one gridded pallas_call per forward invocation)
# ----------------------------------------------------------------------------
@functools.partial(jax.jit, static_argnames=("with_pred1", "with_pred2", "tile_b"))
def fused_pair_forward(prep, x1_ids, x2_ids, *, with_pred1, with_pred2,
                       tile_b=128):
    B, nd = x1_ids.shape
    folded = prep["folded"]
    D = folded.shape[1]
    E = folded.shape[0] // nd

    tb = min(int(tile_b), _round_up(B, 8))
    Bp = _round_up(B, tb)
    nblk = Bp // tb

    x1p = _pad_batch_i32(x1_ids, Bp)
    x2p = _pad_batch_i32(x2_ids, Bp)
    # per-tile stacking: tile i = [x1 rows of tile i ; x2 rows of tile i]
    ids_stacked = jnp.concatenate(
        [x1p.reshape(nblk, tb, nd), x2p.reshape(nblk, tb, nd)], axis=1
    ).reshape(2 * Bp, nd)

    weights = [folded, prep["g_b"], prep["w1"], prep["b1"], prep["w2"],
               prep["b2"], prep["w3"], prep["b3"], prep["wa"], prep["ba"]]
    n_pred = int(bool(with_pred1)) + int(bool(with_pred2))
    if n_pred:  # classifier weights only DMA'd when actually used
        weights += [prep["c_w"], prep["c_b"]]

    in_specs = [pl.BlockSpec((2 * tb, nd), lambda i: (i, 0))]
    in_specs += [_const_spec(w.shape) for w in weights]

    agree_shape = jax.ShapeDtypeStruct((Bp, OUT_LANES), jnp.float32)
    agree_spec = pl.BlockSpec((tb, OUT_LANES), lambda i: (i, 0))
    if n_pred:
        out_shape = (agree_shape,
                     jax.ShapeDtypeStruct((Bp, OUT_LANES), jnp.int32))
        out_specs = (agree_spec, pl.BlockSpec((tb, OUT_LANES), lambda i: (i, 0)))
    else:
        out_shape = agree_shape
        out_specs = agree_spec

    # rough per-tile VMEM budget: one-hot + activations + double-buffered io
    rows = 2 * tb
    width = nd * E
    hcols = sum(int(w.shape[1]) for w in weights)
    per_tile = rows * (width * 6 + (D + hcols) * 8) \
        + 2 * (2 * tb * nd * 4 + (1 + n_pred) * tb * OUT_LANES * 4)
    params = pltpu.CompilerParams(
        dimension_semantics=("parallel",),
        vmem_limit_bytes=_vmem_limit_bytes(weights, per_tile))

    kern = functools.partial(_pair_kernel,
                             with_pred1=bool(with_pred1),
                             with_pred2=bool(with_pred2))
    res = pl.pallas_call(
        kern, grid=(nblk,), in_specs=in_specs, out_specs=out_specs,
        out_shape=out_shape, compiler_params=params,
    )(ids_stacked, *weights)

    if n_pred:
        agree_full, pred_full = res
    else:
        agree_full, pred_full = res, None

    agree = agree_full[:B, 0:1]                         # (B, 1) float32
    pred1 = pred_full[:B, 0] if with_pred1 else None
    pred2 = pred_full[:B, 1] if with_pred2 else None
    return agree, pred1, pred2


@functools.partial(jax.jit, static_argnames=("num_classes", "tile_b"))
def fused_single_forward(prep, x_ids, *, num_classes, tile_b=128):
    B, nd = x_ids.shape
    folded = prep["folded"]
    D = folded.shape[1]
    E = folded.shape[0] // nd
    Cp = prep["c_w"].shape[1]

    tb = min(int(tile_b), _round_up(B, 8))
    Bp = _round_up(B, tb)
    nblk = Bp // tb
    xp = _pad_batch_i32(x_ids, Bp)

    weights = [folded, prep["g_b"], prep["c_w"], prep["c_b"]]
    in_specs = [pl.BlockSpec((tb, nd), lambda i: (i, 0))]
    in_specs += [_const_spec(w.shape) for w in weights]

    width = nd * E
    per_tile = tb * (width * 6 + (D + Cp) * 8) \
        + 2 * (tb * nd * 4 + tb * Cp * 4)
    params = pltpu.CompilerParams(
        dimension_semantics=("parallel",),
        vmem_limit_bytes=_vmem_limit_bytes(weights, per_tile))

    probs = pl.pallas_call(
        _single_kernel, grid=(nblk,), in_specs=in_specs,
        out_specs=pl.BlockSpec((tb, Cp), lambda i: (i, 0)),
        out_shape=jax.ShapeDtypeStruct((Bp, Cp), jnp.float32),
        compiler_params=params,
    )(xp, *weights)
    return probs[:B, :num_classes]


# ----------------------------------------------------------------------------
# Parameter construction (deterministic, synthetic) + kernel-side preparation
# ----------------------------------------------------------------------------
def _dense_params(key, fan_in, fan_out, scale):
    w = scale * jax.random.normal(key, (fan_in, fan_out), dtype=jnp.float32)
    b = jnp.zeros((1, fan_out), dtype=jnp.float32)
    return w, b


def build_net_params(key, node_emb_dim, num_domains, num_entities,
                     gam_encoder_dims, num_classes):
    """Raw f32 parameters mirroring the PyTorch module structure."""
    D = node_emb_dim * num_domains
    keys = jax.random.split(key, 8)
    params = {}
    # frozen "pretrained" node embedding matrix [num_entities, node_emb_dim]
    params["node_emb"] = 0.5 * jax.random.normal(
        keys[0], (num_entities, node_emb_dim), dtype=jnp.float32)
    # graph_net projection: D -> gnet_output_dimensions (= D)
    params["g_w"], params["g_b"] = _dense_params(keys[1], D, D, 0.3)
    # gam_net: encoder [D -> h1 -> h2 -> h3], agreement head h3 -> 1
    h1, h2, h3 = gam_encoder_dims
    gw1, gb1 = _dense_params(keys[2], D, h1, 0.3)
    gw2, gb2 = _dense_params(keys[3], h1, h2, 0.3)
    gw3, gb3 = _dense_params(keys[4], h2, h3, 0.3)
    wa_row = 0.5 * jax.random.normal(keys[5], (1, h3), dtype=jnp.float32)
    ba = jnp.zeros((1, 1), dtype=jnp.float32)
    params["gam"] = dict(w1=gw1, b1=gb1, w2=gw2, b2=gb2, w3=gw3, b3=gb3,
                         wa_row=wa_row, ba=ba)
    # clf_net: clf_layer_dimensions == []  ->  single Linear(D -> num_classes)
    params["c_w"], params["c_b"] = _dense_params(keys[6], D, num_classes, 0.3)
    return params


def prepare_kernel_params(raw, node_emb_dim, num_domains):
    """Fold the frozen embedding into the graph projection (in f32, exact),
    zero-pad encoder/classifier to 128-lane widths (numerically exact), and
    cast matmul operands to bf16 (biases and the agreement row stay f32)."""
    e = node_emb_dim
    nd = num_domains
    node_emb = raw["node_emb"].astype(jnp.float32)                   # (E, e)
    g_w = raw["g_w"].astype(jnp.float32)                             # (nd*e, D)
    D = g_w.shape[1]
    folded = jnp.concatenate(
        [node_emb @ g_w[j * e:(j + 1) * e, :] for j in range(nd)], axis=0)

    gam = raw["gam"]
    h1, h2, h3 = (gam["w1"].shape[1], gam["w2"].shape[1], gam["w3"].shape[1])
    h1p, h2p, h3p = (_round_up(h, LANE) for h in (h1, h2, h3))
    C = raw["c_w"].shape[1]
    Cp = _round_up(C, LANE)

    return dict(
        folded=folded.astype(jnp.bfloat16),                          # (nd*E, D)
        g_b=raw["g_b"].astype(jnp.float32),                          # (1, D)
        w1=_pad2d(gam["w1"], D, h1p).astype(jnp.bfloat16),
        b1=_pad2d(gam["b1"], 1, h1p).astype(jnp.float32),
        w2=_pad2d(gam["w2"], h1p, h2p).astype(jnp.bfloat16),
        b2=_pad2d(gam["b2"], 1, h2p).astype(jnp.float32),
        w3=_pad2d(gam["w3"], h2p, h3p).astype(jnp.bfloat16),
        b3=_pad2d(gam["b3"], 1, h3p).astype(jnp.float32),
        wa=_pad2d(gam["wa_row"], 1, h3p).astype(jnp.float32),
        ba=gam["ba"].astype(jnp.float32),
        c_w=_pad2d(raw["c_w"], D, Cp).astype(jnp.bfloat16),
        c_b=_pad2d(raw["c_b"], 1, Cp, fill=PAD_BIAS).astype(jnp.float32),
    )


# ----------------------------------------------------------------------------
# JAX/Pallas counterpart of the PyTorch `net` module (forward only)
# ----------------------------------------------------------------------------
class NetPallas:
    def __init__(self, raw_params, node_emb_dim, num_domains, tile_b=128):
        self.raw = raw_params
        self.prep = prepare_kernel_params(raw_params, node_emb_dim, num_domains)
        self.num_classes = int(raw_params["c_w"].shape[1])
        self.tile_b = int(tile_b)
        self.train_mode = False
        self.test_mode = False

    def forward(self, input_x, input_y=None):
        p = self.prep
        if self.train_mode == "g":
            x1_ids, x2_ids = input_x
            agree, _, _ = fused_pair_forward(p, x1_ids, x2_ids,
                                             with_pred1=False, with_pred2=False,
                                             tile_b=self.tile_b)
            return agree
        elif self.train_mode == "f":
            return fused_single_forward(p, input_x,
                                        num_classes=self.num_classes,
                                        tile_b=self.tile_b)
        elif self.train_mode in ("f_ll", "f_ul"):
            x1_ids, x2_ids = input_x
            agree, pred1, _ = fused_pair_forward(p, x1_ids, x2_ids,
                                                 with_pred1=True,
                                                 with_pred2=False,
                                                 tile_b=self.tile_b)
            return agree, pred1
        elif self.train_mode == "f_uu":
            x1_ids, x2_ids = input_x
            return fused_pair_forward(p, x1_ids, x2_ids,
                                      with_pred1=True, with_pred2=True,
                                      tile_b=self.tile_b)
        if self.test_mode is True:
            return fused_single_forward(p, input_x,
                                        num_classes=self.num_classes,
                                        tile_b=self.tile_b)


# ----------------------------------------------------------------------------
# Pure-JAX f32 reference (unfused, unpadded) for correctness checks
# ----------------------------------------------------------------------------
def _ref_graph(raw, ids):
    emb = raw["node_emb"][ids]                       # (B, nd, e) gather
    flat = emb.reshape(ids.shape[0], -1)             # (B, nd*e) concat
    return jnp.tanh(flat @ raw["g_w"] + raw["g_b"])


def _ref_encoder(raw, g):
    gam = raw["gam"]
    h = jnp.tanh(g @ gam["w1"] + gam["b1"])
    h = jnp.tanh(h @ gam["w2"] + gam["b2"])
    h = jnp.tanh(h @ gam["w3"] + gam["b3"])
    return h


def _ref_pair(raw, x1, x2):
    g1, g2 = _ref_graph(raw, x1), _ref_graph(raw, x2)
    e1, e2 = _ref_encoder(raw, g1), _ref_encoder(raw, g2)
    z = jnp.abs(e1 - e2)
    agree = jax.nn.sigmoid(z @ raw["gam"]["wa_row"].T + raw["gam"]["ba"])
    p1 = jnp.argmax(g1 @ raw["c_w"] + raw["c_b"], axis=1)
    p2 = jnp.argmax(g2 @ raw["c_w"] + raw["c_b"], axis=1)
    return agree, p1, p2


def _ref_single(raw, x):
    g = _ref_graph(raw, x)
    return jax.nn.softmax(g @ raw["c_w"] + raw["c_b"], axis=-1)


# ----------------------------------------------------------------------------
# Demo
# ----------------------------------------------------------------------------
if __name__ == "__main__":
    # small, module-consistent sizes
    node_emb_dim = 32
    num_domains = 4                      # record feature dim D = 128
    num_entities = 64
    gam_encoder_dims = [64, 64, 32]      # non-aligned widths, zero-padded internally
    num_classes = 2
    batch = 8

    key = jax.random.PRNGKey(0)
    pkey, k1, k2 = jax.random.split(key, 3)
    raw = build_net_params(pkey, node_emb_dim, num_domains, num_entities,
                           gam_encoder_dims, num_classes)
    NN = NetPallas(raw, node_emb_dim, num_domains, tile_b=128)

    x1_ids = jax.random.randint(k1, (batch, num_domains), 0, num_entities,
                                dtype=jnp.int32)
    x2_ids = jax.random.randint(k2, (batch, num_domains), 0, num_entities,
                                dtype=jnp.int32)

    # pure-JAX f32 reference
    ref_agree, ref_p1, ref_p2 = _ref_pair(raw, x1_ids, x2_ids)
    ref_probs = _ref_single(raw, x1_ids)

    # 'g' path: agreement only
    NN.train_mode = "g"
    agree = NN.forward((x1_ids, x2_ids))
    jax.block_until_ready(agree)
    assert agree.shape == (batch, 1)
    assert bool(jnp.all(jnp.isfinite(agree)))
    assert bool(jnp.allclose(agree, ref_agree, atol=1e-1))

    # 'f_ll' path: agreement + argmax(clf(x1))
    NN.train_mode = "f_ll"
    pa, p1 = NN.forward((x1_ids, x2_ids))
    jax.block_until_ready((pa, p1))
    assert pa.shape == (batch, 1) and p1.shape == (batch,)
    assert p1.dtype == jnp.int32
    assert bool(jnp.all((p1 >= 0) & (p1 < num_classes)))
    assert bool(jnp.allclose(pa, ref_agree, atol=1e-1))

    # 'f_uu' path: agreement + argmax(clf(x1)) + argmax(clf(x2))
    NN.train_mode = "f_uu"
    pred_agreement, pred_y1, pred_y2 = NN.forward((x1_ids, x2_ids))
    jax.block_until_ready((pred_agreement, pred_y1, pred_y2))
    assert pred_agreement.shape == (batch, 1)
    assert pred_y1.shape == (batch,) and pred_y2.shape == (batch,)
    assert bool(jnp.all((pred_y1 >= 0) & (pred_y1 < num_classes)))
    assert bool(jnp.all((pred_y2 >= 0) & (pred_y2 < num_classes)))

    # test / classification path (softmax probabilities)
    NN.train_mode = False
    NN.test_mode = True
    y_pred = NN.forward(x1_ids)
    jax.block_until_ready(y_pred)
    assert y_pred.shape == (batch, num_classes)
    assert bool(jnp.allclose(jnp.sum(y_pred, axis=-1), 1.0, atol=1e-3))
    assert bool(jnp.allclose(y_pred, ref_probs, atol=1e-1))

    print("KERNEL_OK")
</pallas_src>

<mosaic_0001>
module attributes {stable_mosaic.version = 11 : i64} {
  func.func @_pair_kernel(%arg0: i32, %arg1: memref<16x4xi32, #tpu.memory_space<vmem>>, %arg2: memref<256x128xbf16, #tpu.memory_space<vmem>>, %arg3: memref<1x128xf32, #tpu.memory_space<vmem>>, %arg4: memref<128x128xbf16, #tpu.memory_space<vmem>>, %arg5: memref<1x128xf32, #tpu.memory_space<vmem>>, %arg6: memref<128x128xbf16, #tpu.memory_space<vmem>>, %arg7: memref<1x128xf32, #tpu.memory_space<vmem>>, %arg8: memref<128x128xbf16, #tpu.memory_space<vmem>>, %arg9: memref<1x128xf32, #tpu.memory_space<vmem>>, %arg10: memref<1x128xf32, #tpu.memory_space<vmem>>, %arg11: memref<1x1xf32, #tpu.memory_space<vmem>>, %arg12: memref<8x128xf32, #tpu.memory_space<vmem>>) attributes {dimension_semantics = [#tpu.dimension_semantics<parallel>], iteration_bounds = array<i64: 1>, scalar_prefetch = 0 : i64, scratch_operands = 0 : i64, tpu.core_type = #tpu.core_type<tc>, window_params = [{transform_indices = @transform_0, window_bounds = array<i64: 16, 4>}, {pipeline_mode = #tpu.pipeline_mode<synchronous>, transform_indices = @transform_1, window_bounds = array<i64: 256, 128>}, {pipeline_mode = #tpu.pipeline_mode<synchronous>, transform_indices = @transform_2, window_bounds = array<i64: 1, 128>}, {pipeline_mode = #tpu.pipeline_mode<synchronous>, transform_indices = @transform_3, window_bounds = array<i64: 128, 128>}, {pipeline_mode = #tpu.pipeline_mode<synchronous>, transform_indices = @transform_4, window_bounds = array<i64: 1, 128>}, {pipeline_mode = #tpu.pipeline_mode<synchronous>, transform_indices = @transform_5, window_bounds = array<i64: 128, 128>}, {pipeline_mode = #tpu.pipeline_mode<synchronous>, transform_indices = @transform_6, window_bounds = array<i64: 1, 128>}, {pipeline_mode = #tpu.pipeline_mode<synchronous>, transform_indices = @transform_7, window_bounds = array<i64: 128, 128>}, {pipeline_mode = #tpu.pipeline_mode<synchronous>, transform_indices = @transform_8, window_bounds = array<i64: 1, 128>}, {pipeline_mode = #tpu.pipeline_mode<synchronous>, transform_indices = @transform_9, window_bounds = array<i64: 1, 128>}, {pipeline_mode = #tpu.pipeline_mode<synchronous>, transform_indices = @transform_10, window_bounds = array<i64: 1, 1>}, {transform_indices = @transform_11, window_bounds = array<i64: 8, 128>}]} {
    %c0 = arith.constant 0 : index
    %c0_0 = arith.constant 0 : index
    %0 = vector.load %arg1[%c0, %c0_0] : memref<16x4xi32, #tpu.memory_space<vmem>>, vector<16x4xi32>
    %1 = tpu.iota {dimensions = array<i32: 1>} : vector<16x256xi32>
    %2 = vector.extract_strided_slice %0 {offsets = [0, 0], sizes = [16, 1], strides = [1, 1]} : vector<16x4xi32> to vector<16x1xi32>
    %3 = vector.broadcast %2 : vector<16x1xi32> to vector<16x256xi32>
    %4 = arith.cmpi eq, %1, %3 : vector<16x256xi32>
    %5 = arith.extui %4 : vector<16x256xi1> to vector<16x256xi32>
    %6 = arith.sitofp %5 : vector<16x256xi32> to vector<16x256xf32>
    %7 = vector.extract_strided_slice %0 {offsets = [0, 1], sizes = [16, 1], strides = [1, 1]} : vector<16x4xi32> to vector<16x1xi32>
    %c64_i32 = arith.constant 64 : i32
    %8 = vector.broadcast %c64_i32 : i32 to vector<16x1xi32>
    %9 = arith.addi %7, %8 : vector<16x1xi32>
    %10 = vector.broadcast %9 : vector<16x1xi32> to vector<16x256xi32>
    %11 = arith.cmpi eq, %1, %10 : vector<16x256xi32>
    %12 = arith.extui %11 : vector<16x256xi1> to vector<16x256xi32>
    %13 = arith.sitofp %12 : vector<16x256xi32> to vector<16x256xf32>
    %14 = arith.addf %6, %13 : vector<16x256xf32>
    %15 = vector.extract_strided_slice %0 {offsets = [0, 2], sizes = [16, 1], strides = [1, 1]} : vector<16x4xi32> to vector<16x1xi32>
    %c128_i32 = arith.constant 128 : i32
    %16 = vector.broadcast %c128_i32 : i32 to vector<16x1xi32>
    %17 = arith.addi %15, %16 : vector<16x1xi32>
    %18 = vector.broadcast %17 : vector<16x1xi32> to vector<16x256xi32>
    %19 = arith.cmpi eq, %1, %18 : vector<16x256xi32>
    %20 = arith.extui %19 : vector<16x256xi1> to vector<16x256xi32>
    %21 = arith.sitofp %20 : vector<16x256xi32> to vector<16x256xf32>
    %22 = arith.addf %14, %21 : vector<16x256xf32>
    %23 = vector.extract_strided_slice %0 {offsets = [0, 3], sizes = [16, 1], strides = [1, 1]} : vector<16x4xi32> to vector<16x1xi32>
    %c192_i32 = arith.constant 192 : i32
    %24 = vector.broadcast %c192_i32 : i32 to vector<16x1xi32>
    %25 = arith.addi %23, %24 : vector<16x1xi32>
    %26 = vector.broadcast %25 : vector<16x1xi32> to vector<16x256xi32>
    %27 = arith.cmpi eq, %1, %26 : vector<16x256xi32>
    %28 = arith.extui %27 : vector<16x256xi1> to vector<16x256xi32>
    %29 = arith.sitofp %28 : vector<16x256xi32> to vector<16x256xf32>
    %30 = arith.addf %22, %29 : vector<16x256xf32>
    %31 = arith.truncf %30 : vector<16x256xf32> to vector<16x256xbf16>
    %c0_1 = arith.constant 0 : index
    %c0_2 = arith.constant 0 : index
    %32 = vector.load %arg2[%c0_1, %c0_2] : memref<256x128xbf16, #tpu.memory_space<vmem>>, vector<256x128xbf16>
    %cst = arith.constant dense<0.000000e+00> : vector<16x128xf32>
    %33 = tpu.matmul %31, %32, %cst {dimension_numbers = #tpu.dot_dimension_numbers<[1], [0], [0], [1], [0, 0, 1, 1], [], []>} : vector<16x256xbf16>, vector<256x128xbf16>, vector<16x128xf32> -> vector<16x128xf32>
    %c0_3 = arith.constant 0 : index
    %c0_4 = arith.constant 0 : index
    %34 = vector.load %arg3[%c0_3, %c0_4] : memref<1x128xf32, #tpu.memory_space<vmem>>, vector<1x128xf32>
    %35 = vector.broadcast %34 : vector<1x128xf32> to vector<16x128xf32>
    %36 = arith.addf %33, %35 : vector<16x128xf32>
    %37 = math.tanh %36 : vector<16x128xf32>
    %38 = arith.truncf %37 : vector<16x128xf32> to vector<16x128xbf16>
    %c0_5 = arith.constant 0 : index
    %c0_6 = arith.constant 0 : index
    %39 = vector.load %arg4[%c0_5, %c0_6] : memref<128x128xbf16, #tpu.memory_space<vmem>>, vector<128x128xbf16>
    %cst_7 = arith.constant dense<0.000000e+00> : vector<16x128xf32>
    %40 = tpu.matmul %38, %39, %cst_7 {dimension_numbers = #tpu.dot_dimension_numbers<[1], [0], [0], [1], [0, 0, 1, 1], [], []>} : vector<16x128xbf16>, vector<128x128xbf16>, vector<16x128xf32> -> vector<16x128xf32>
    %c0_8 = arith.constant 0 : index
    %c0_9 = arith.constant 0 : index
    %41 = vector.load %arg5[%c0_8, %c0_9] : memref<1x128xf32, #tpu.memory_space<vmem>>, vector<1x128xf32>
    %42 = vector.broadcast %41 : vector<1x128xf32> to vector<16x128xf32>
    %43 = arith.addf %40, %42 : vector<16x128xf32>
    %44 = math.tanh %43 : vector<16x128xf32>
    %45 = arith.truncf %44 : vector<16x128xf32> to vector<16x128xbf16>
    %c0_10 = arith.constant 0 : index
    %c0_11 = arith.constant 0 : index
    %46 = vector.load %arg6[%c0_10, %c0_11] : memref<128x128xbf16, #tpu.memory_space<vmem>>, vector<128x128xbf16>
    %cst_12 = arith.constant dense<0.000000e+00> : vector<16x128xf32>
    %47 = tpu.matmul %45, %46, %cst_12 {dimension_numbers = #tpu.dot_dimension_numbers<[1], [0], [0], [1], [0, 0, 1, 1], [], []>} : vector<16x128xbf16>, vector<128x128xbf16>, vector<16x128xf32> -> vector<16x128xf32>
    %c0_13 = arith.constant 0 : index
    %c0_14 = arith.constant 0 : index
    %48 = vector.load %arg7[%c0_13, %c0_14] : memref<1x128xf32, #tpu.memory_space<vmem>>, vector<1x128xf32>
    %49 = vector.broadcast %48 : vector<1x128xf32> to vector<16x128xf32>
    %50 = arith.addf %47, %49 : vector<16x128xf32>
    %51 = math.tanh %50 : vector<16x128xf32>
    %52 = arith.truncf %51 : vector<16x128xf32> to vector<16x128xbf16>
    %c0_15 = arith.constant 0 : index
    %c0_16 = arith.constant 0 : index
    %53 = vector.load %arg8[%c0_15, %c0_16] : memref<128x128xbf16, #tpu.memory_space<vmem>>, vector<128x128xbf16>
    %cst_17 = arith.constant dense<0.000000e+00> : vector<16x128xf32>
    %54 = tpu.matmul %52, %53, %cst_17 {dimension_numbers = #tpu.dot_dimension_numbers<[1], [0], [0], [1], [0, 0, 1, 1], [], []>} : vector<16x128xbf16>, vector<128x128xbf16>, vector<16x128xf32> -> vector<16x128xf32>
    %c0_18 = arith.constant 0 : index
    %c0_19 = arith.constant 0 : index
    %55 = vector.load %arg9[%c0_18, %c0_19] : memref<1x128xf32, #tpu.memory_space<vmem>>, vector<1x128xf32>
    %56 = vector.broadcast %55 : vector<1x128xf32> to vector<16x128xf32>
    %57 = arith.addf %54, %56 : vector<16x128xf32>
    %58 = math.tanh %57 : vector<16x128xf32>
    %59 = vector.extract_strided_slice %58 {offsets = [0, 0], sizes = [8, 128], strides = [1, 1]} : vector<16x128xf32> to vector<8x128xf32>
    %60 = vector.extract_strided_slice %58 {offsets = [8, 0], sizes = [8, 128], strides = [1, 1]} : vector<16x128xf32> to vector<8x128xf32>
    %61 = arith.subf %59, %60 : vector<8x128xf32>
    %62 = math.absf %61 : vector<8x128xf32>
    %c0_20 = arith.constant 0 : index
    %c0_21 = arith.constant 0 : index
    %63 = vector.load %arg10[%c0_20, %c0_21] : memref<1x128xf32, #tpu.memory_space<vmem>>, vector<1x128xf32>
    %64 = vector.broadcast %63 : vector<1x128xf32> to vector<8x128xf32>
    %65 = arith.mulf %62, %64 : vector<8x128xf32>
    %cst_22 = arith.constant dense<0.000000e+00> : vector<8xf32>
    %66 = vector.multi_reduction <add>, %65, %cst_22 [1] : vector<8x128xf32> to vector<8xf32>
    %67 = vector.shape_cast %66 : vector<8xf32> to vector<8x1xf32>
    %c0_23 = arith.constant 0 : index
    %c0_24 = arith.constant 0 : index
    %68 = vector.load %arg11[%c0_23, %c0_24] : memref<1x1xf32, #tpu.memory_space<vmem>>, vector<1x1xf32>
    %69 = vector.broadcast %68 : vector<1x1xf32> to vector<8x1xf32>
    %70 = arith.addf %67, %69 : vector<8x1xf32>
    %cst_25 = arith.constant 5.000000e-01 : f32
    %71 = vector.broadcast %cst_25 : f32 to vector<8x1xf32>
    %72 = arith.mulf %71, %70 : vector<8x1xf32>
    %73 = math.tanh %72 : vector<8x1xf32>
    %cst_26 = arith.constant 1.000000e+00 : f32
    %74 = vector.broadcast %cst_26 : f32 to vector<8x1xf32>
    %75 = arith.addf %73, %74 : vector<8x1xf32>
    %cst_27 = arith.constant 5.000000e-01 : f32
    %76 = vector.broadcast %cst_27 : f32 to vector<8x1xf32>
    %77 = arith.mulf %76, %75 : vector<8x1xf32>
    %78 = vector.shape_cast %77 : vector<8x1xf32> to vector<8x1xf32>
    %79 = vector.broadcast %78 : vector<8x1xf32> to vector<8x128xf32>
    %c0_28 = arith.constant 0 : index
    %c0_29 = arith.constant 0 : index
    %80 = vector.load %arg12[%c0_28, %c0_29] : memref<8x128xf32, #tpu.memory_space<vmem>>, vector<8x128xf32>
    tpu.vector_store %arg12[%c0_28, %c0_29], %79 {strides = array<i32>} : memref<8x128xf32, #tpu.memory_space<vmem>>, vector<8x128xf32>,
    return
  }
  func.func @transform_0(%arg0: i32) -> (i32, i32) {
    %c0_i32 = arith.constant 0 : i32
    %c0_i32_0 = arith.constant 0 : i32
    return %arg0, %c0_i32 : i32, i32
  }
  func.func @transform_1(%arg0: i32) -> (i32, i32) {
    %c0_i32 = arith.constant 0 : i32
    %c0_i32_0 = arith.constant 0 : i32
    %c0_i32_1 = arith.constant 0 : i32
    return %c0_i32, %c0_i32_0 : i32, i32
  }
  func.func @transform_2(%arg0: i32) -> (i32, i32) {
    %c0_i32 = arith.constant 0 : i32
    %c0_i32_0 = arith.constant 0 : i32
    %c0_i32_1 = arith.constant 0 : i32
    return %c0_i32, %c0_i32_0 : i32, i32
  }
  func.func @transform_3(%arg0: i32) -> (i32, i32) {
    %c0_i32 = arith.constant 0 : i32
    %c0_i32_0 = arith.constant 0 : i32
    %c0_i32_1 = arith.constant 0 : i32
    return %c0_i32, %c0_i32_0 : i32, i32
  }
  func.func @transform_4(%arg0: i32) -> (i32, i32) {
    %c0_i32 = arith.constant 0 : i32
    %c0_i32_0 = arith.constant 0 : i32
    %c0_i32_1 = arith.constant 0 : i32
    return %c0_i32, %c0_i32_0 : i32, i32
  }
  func.func @transform_5(%arg0: i32) -> (i32, i32) {
    %c0_i32 = arith.constant 0 : i32
    %c0_i32_0 = arith.constant 0 : i32
    %c0_i32_1 = arith.constant 0 : i32
    return %c0_i32, %c0_i32_0 : i32, i32
  }
  func.func @transform_6(%arg0: i32) -> (i32, i32) {
    %c0_i32 = arith.constant 0 : i32
    %c0_i32_0 = arith.constant 0 : i32
    %c0_i32_1 = arith.constant 0 : i32
    return %c0_i32, %c0_i32_0 : i32, i32
  }
  func.func @transform_7(%arg0: i32) -> (i32, i32) {
    %c0_i32 = arith.constant 0 : i32
    %c0_i32_0 = arith.constant 0 : i32
    %c0_i32_1 = arith.constant 0 : i32
    return %c0_i32, %c0_i32_0 : i32, i32
  }
  func.func @transform_8(%arg0: i32) -> (i32, i32) {
    %c0_i32 = arith.constant 0 : i32
    %c0_i32_0 = arith.constant 0 : i32
    %c0_i32_1 = arith.constant 0 : i32
    return %c0_i32, %c0_i32_0 : i32, i32
  }
  func.func @transform_9(%arg0: i32) -> (i32, i32) {
    %c0_i32 = arith.constant 0 : i32
    %c0_i32_0 = arith.constant 0 : i32
    %c0_i32_1 = arith.constant 0 : i32
    return %c0_i32, %c0_i32_0 : i32, i32
  }
  func.func @transform_10(%arg0: i32) -> (i32, i32) {
    %c0_i32 = arith.constant 0 : i32
    %c0_i32_0 = arith.constant 0 : i32
    %c0_i32_1 = arith.constant 0 : i32
    return %c0_i32, %c0_i32_0 : i32, i32
  }
  func.func @transform_11(%arg0: i32) -> (i32, i32) {
    %c0_i32 = arith.constant 0 : i32
    %c0_i32_0 = arith.constant 0 : i32
    return %arg0, %c0_i32 : i32, i32
  }
}

</mosaic_0001>

<bundles_post_ra>
// kernel: fused_pair_forward.1
= control target key start
LH: loop header
LB: loop body
LE: loop exit
PB: predicated region body
PF: predicated region fallthrough
CT: control target
= control target key end

     0   :  { %s1256_s0 = inlined_call_operand.vmem [shape: s32[16,4], index: 0, kind: input, shape index: {}]   ;;  %s1257_s1 = inlined_call_operand.hbm [shape: bf16[256,128], index: 1, kind: input, shape index: {}]   ;;  %s1258_s2 = inlined_call_operand.vmem [shape: f32[1,128], index: 2, kind: input, shape index: {}]   ;;  %s1259_s3 = inlined_call_operand.hbm [shape: bf16[128,128], index: 3, kind: input, shape index: {}]   ;;  %s1260_s4 = inlined_call_operand.vmem [shape: f32[1,128], index: 4, kind: input, shape index: {}]   ;;  %s1261_s5 = inlined_call_operand.hbm [shape: bf16[128,128], index: 5, kind: input, shape index: {}]   ;;  %s1262_s6 = inlined_call_operand.vmem [shape: f32[1,128], index: 6, kind: input, shape index: {}]   ;;  %s1263_s7 = inlined_call_operand.hbm [shape: bf16[128,128], index: 7, kind: input, shape index: {}]   ;;  %s1264_s8 = inlined_call_operand.vmem [shape: f32[1,128], index: 8, kind: input, shape index: {}]   ;;  %s1265_s9 = inlined_call_operand.vmem [shape: f32[1,128], index: 9, kind: input, shape index: {}]   ;;  %s1266_s10 = inlined_call_operand.<no memory space> [shape: f32[1,1], index: 10, kind: input, shape index: {}]   ;;  %s1267_s11 = inlined_call_operand.vmem [shape: f32[8,128], index: 11, kind: output, shape index: {}]  }
   0x1   :  { %v16_v0 = vstv %s1266_s10 }
   0x2   :  { %17 = vst [vmem:[#allocation2] sm:$0x1] %v16_v0 }
   0x3   :  { %18 = vsyncpa [#allocation4], 0 }
   0x4   :  { %19 = vsyncpa [#allocation6], 0 }
   0x5   :  { %20 = vsyncpa [#allocation9], 0  ;;  %s1087_s19 = smov [#allocation5]   ;;  %s1088_s21 = smov [#allocation3]  }
   0x6   :  { %s42_s20 = sshll.u32 %s1087_s19, 4  ;;  %s28_s22 = sshll.u32 %s1088_s21, 4  ;;  %s43_s20 = int_to_ptr.vmem [resolvable:$true] %s42_s20  ;;  %s29_s22 = int_to_ptr.vmem [resolvable:$true] %s28_s22 }
   0x7   :  { %s1009_s23 = scalar_lea.vmem %s43_s20, 1024  ;;  %p1014_p1 = scmp.lt.s32.totalorder %s43_s20, %s43_s20 }
   0x8   :  { %p1010_p0 = scmp.ne.s32.totalorder %s43_s20, %s1009_s23  ;;  %p1015_p2 = scmp.lt.s32.totalorder %s1009_s23, %s1009_s23 }
   0xa   :  { %p1016_p3 = por %p1015_p2, %p1014_p1 }
   0xc   :  { %p1017_p4 = pnand %p1016_p3, %p1010_p0 }
   0xe   :  { %1020 = shalt.err (!%p1017_p4)
}
   0xf   :  { %s1089_s24 = smov 64   ;;  %s1090_s25 = smov 4  }
  0x10   :  { %48 = dma.hbm_to_vmem [thread:$0]  %s1259_s3, 1024, %s43_s20, [#allocation6], %s1089_s24, %s1089_s24, %s1090_s25  }
  0x11   :  { %s1029_s27 = scalar_lea.vmem %s29_s22, 2048  ;;  %p1034_p6 = scmp.lt.s32.totalorder %s29_s22, %s29_s22 }
  0x12   :  { %p1030_p5 = scmp.ne.s32.totalorder %s29_s22, %s1029_s27  ;;  %p1035_p7 = scmp.lt.s32.totalorder %s1029_s27, %s1029_s27 }
  0x14   :  { %p1036_p8 = por %p1035_p7, %p1034_p6 }
  0x16   :  { %p1037_p9 = pnand %p1036_p8, %p1030_p5 }
  0x18   :  { %1040 = shalt.err (!%p1037_p9)
}
  0x19   :  { %34 = dma.hbm_to_vmem [thread:$0]  %s1257_s1, 2048, %s29_s22, [#allocation4], %s1089_s24, %s1089_s24, %s1090_s25  }
  0x1a   :  { %s1091_s30 = smov [#allocation7]   ;;  %s1092_s13 = smov [#allocation8]  }
  0x1b   :  { %s56_s12 = sshll.u32 %s1091_s30, 4  ;;  %s70_s14 = sshll.u32 %s1092_s13, 4  ;;  %s57_s12 = int_to_ptr.vmem [resolvable:$true] %s56_s12  ;;  %s71_s14 = int_to_ptr.vmem [resolvable:$true] %s70_s14 }
  0x1c   :  { %s1049_s3 = scalar_lea.vmem %s57_s12, 1024  ;;  %p1054_p11 = scmp.lt.s32.totalorder %s57_s12, %s57_s12 }
  0x1d   :  { %p1050_p10 = scmp.ne.s32.totalorder %s57_s12, %s1049_s3  ;;  %p1055_p12 = scmp.lt.s32.totalorder %s1049_s3, %s1049_s3 }
  0x1f   :  { %p1056_p13 = por %p1055_p12, %p1054_p11 }
  0x21   :  { %p1057_p0 = pnand %p1056_p13, %p1050_p10 }
  0x23   :  { %1060 = shalt.err (!%p1057_p0)
}
  0x24   :  { %62 = dma.hbm_to_vmem [thread:$0]  %s1261_s5, 1024, %s57_s12, [#allocation6], %s1089_s24, %s1089_s24, %s1090_s25  }
  0x25   :  { %s1069_s1 = scalar_lea.vmem %s71_s14, 1024  ;;  %p1074_p2 = scmp.lt.s32.totalorder %s71_s14, %s71_s14 }
  0x26   :  { %p1070_p1 = scmp.ne.s32.totalorder %s71_s14, %s1069_s1  ;;  %p1075_p3 = scmp.lt.s32.totalorder %s1069_s1, %s1069_s1 }
  0x28   :  { %p1076_p4 = por %p1075_p3, %p1074_p2 }
  0x2a   :  { %p1077_p5 = pnand %p1076_p4, %p1070_p1 }
  0x2c   :  { %1080 = shalt.err (!%p1077_p5)
}
  0x2d   :  { %76 = dma.hbm_to_vmem [thread:$0]  %s1263_s7, 1024, %s71_s14, [#allocation9], %s1089_s24, %s1089_s24, %s1090_s25  }
  0x2e   :  { %1081 = dma.done.wait [#allocation4], 2048  }
  0x2f   :  { %1082 = vsyncadd [#allocation4], 4294965248 }
  0x30   :  { %1083 = dma.done.wait [#allocation6], 2048  }
  0x31   :  { %1084 = vsyncadd [#allocation6], 4294965248 }
  0x32   :  { %1085 = dma.done.wait [#allocation9], 1024  }
  0x33   :  { %1086 = vsyncadd [#allocation9], 4294966272  ;;  %v1093_v1 = vmov 0   ;;  %v1094_v2 = vmov 1   ;;  %v1095_v3 = vmov 0.0   ;;  %v96_v4 = vld [vmem:[%s1256_s0] sm:$0xff]  ;;  %v98_v31 = vlaneseq }
  0x34   :  { %936 = vset.pattern.permute.xlu0 %v1093_v1  ;;  %937 = vset.pattern.permute.xlu1 %v1094_v2  ;;  %v97_v5 = vld [vmem:[%s1256_s0 + $0x8] sm:$0xff]  ;;  %v119_v6 = vadd.s32 64, %v96_v4  ;;  %v943_v8 = vld [vmem:[#allocation3 + $0x78] sm:$0xff]   ;;  %v945_v10 = vld [vmem:[#allocation3 + $0x70] sm:$0xff]   ;;  %v143_v12 = vadd.s32 128, %v96_v4  ;;  %v1096_v15 = vmov 2  }
  0x35   :  { %864 = vmatprep.subr.bf16.mxu1 %v1095_v3  ;;  %102 = vperm.xlu0 %936, %v96_v4   ;;  %v120_v7 = vadd.s32 64, %v97_v5  ;;  %v944_v9 = vld [vmem:[#allocation3 + $0x38] sm:$0xff]   ;;  %v946_v11 = vld [vmem:[#allocation3 + $0x30] sm:$0xff]   ;;  %v947_v13 = vld [vmem:[#allocation3 + $0x68] sm:$0xff]   ;;  %v144_v14 = vadd.s32 128, %v97_v5  ;;  %v168_v18 = vadd.s32 192, %v97_v5 }
  0x36   :  { %122 = vperm.xlu1 %937, %v119_v6   ;;  %815 = vmatprep.subr.bf16.mxu0 %v943_v8  ;;  %v948_v16 = vld [vmem:[#allocation3 + $0x28] sm:$0xff]   ;;  %v949_v17 = vld [vmem:[#allocation3 + $0x60] sm:$0xff]   ;;  %v167_v19 = vadd.s32 192, %v96_v4  ;;  %v1097_v21 = vmov 3   ;;  %v951_v22 = vld [vmem:[#allocation3 + $0x58] sm:$0xff]   ;;  %v99_v32 = vand.u32 127, %v98_v31 }
  0x37   :  { %816 = vmatpush3.bf16.msra.mxu0 %v944_v9  ;;  %v950_v20 = vld [vmem:[#allocation3 + $0x20] sm:$0xff]   ;;  %v952_v23 = vld [vmem:[#allocation3 + $0x18] sm:$0xff]   ;;  %v953_v24 = vld [vmem:[#allocation3 + $0x50] sm:$0xff]  }
  0x38   :  { %817 = vmatprep.subr.bf16.mxu0 %v945_v10  ;;  %v954_v25 = vld [vmem:[#allocation3 + $0x10] sm:$0xff]   ;;  %v955_v26 = vld [vmem:[#allocation3 + $0x48] sm:$0xff]   ;;  %v959_v27 = vld [vmem:[#allocation5 + $0x38] sm:$0xff]   ;;  %v100_v35 = vadd.s32 128, %v99_v32 }
  0x39   :  { %105 = vperm.xlu0 %936, %v97_v5   ;;  %865 = vmatpush3.bf16.msra.mxu1 %v959_v27  ;;  %v956_v28 = vld [vmem:[#allocation3 + $0x8] sm:$0xff]   ;;  %v957_v29 = vld [vmem:[#allocation3 + $0x40] sm:$0xff]   ;;  %v960_v9 = vld [vmem:[#allocation5 + $0x30] sm:$0xff]  }
  0x3a   :  { %125 = vperm.xlu1 %937, %v120_v7   ;;  %866 = vmatprep.subr.bf16.mxu1 %v1095_v3  ;;  %v958_v30 = vld [vmem:[#allocation3] sm:$0xff]   ;;  %v961_v10 = vld [vmem:[#allocation5 + $0x28] sm:$0xff]  }
  0x3b   :  { %818 = vmatpush3.bf16.msra.mxu0 %v946_v11  ;;  %v962_v11 = vld [vmem:[#allocation5 + $0x20] sm:$0xff]  }
  0x3c   :  { %819 = vmatprep.subr.bf16.mxu0 %v947_v13  ;;  %v964_v13 = vld [vmem:[#allocation5 + $0x10] sm:$0xff]   ;;  %v970_v31 = vld [vmem:[#allocation7 + $0x20] sm:$0xff]  }
  0x3d   :  { %938 = vset.pattern.permute.xlu0 %v1096_v15  ;;  %867 = vmatpush3.bf16.msra.mxu1 %v960_v9 }
  0x3e   :  { %146 = vperm.xlu0 %938, %v143_v12   ;;  %939 = vset.pattern.permute.xlu1 %v1096_v15  ;;  %v963_v12 = vld [vmem:[#allocation5 + $0x18] sm:$0xff]   ;;  %v966_v15 = vld [vmem:[#allocation5] sm:$0xff]  }
  0x3f   :  { %149 = vperm.xlu1 %939, %v144_v14   ;;  %820 = vmatpush3.bf16.msra.mxu0 %v948_v16  ;;  %v965_v14 = vld [vmem:[#allocation5 + $0x8] sm:$0xff]   ;;  %v967_v16 = vld [vmem:[#allocation7 + $0x38] sm:$0xff]  }
  0x40   :  { %821 = vmatprep.subr.bf16.mxu0 %v949_v17  ;;  %868 = vmatprep.subr.bf16.mxu1 %v1095_v3  ;;  %v968_v17 = vld [vmem:[#allocation7 + $0x30] sm:$0xff]  }
  0x41   :  { %869 = vmatpush3.bf16.msra.mxu1 %v961_v10  ;;  %v813_v10 = vld [vmem:[%s1265_s9] ss:$0 sm:$0xff] }
  0x42   :  { %941 = vset.pattern.permute.xlu0 %v1097_v21  ;;  %870 = vmatprep.subr.bf16.mxu1 %v1095_v3 }
  0x43   :  { %173 = vperm.xlu0 %941, %v168_v18   ;;  %940 = vset.pattern.permute.xlu1 %v1097_v21 }
  0x44   :  { %170 = vperm.xlu1 %940, %v167_v19   ;;  %822 = vmatpush3.bf16.msra.mxu0 %v950_v20  ;;  %v769_v20 = vld [vmem:[%s1258_s2] ss:$0 sm:$0xff] }
  0x45   :  { %823 = vmatprep.subr.bf16.mxu0 %v951_v22  ;;  %871 = vmatpush3.bf16.msra.mxu1 %v962_v11 }
  0x46   :  { %872 = vmatprep.subr.bf16.mxu1 %v1095_v3 }
  0x47   :  { %942 = vset.pattern.permute.xlu0 %v1093_v1 }
  0x48   :  { %824 = vmatpush3.bf16.msra.mxu0 %v952_v23 }
  0x49   :  { %825 = vmatprep.subr.bf16.mxu0 %v953_v24  ;;  %873 = vmatpush3.bf16.msra.mxu1 %v963_v12 }
  0x4a   :  { %874 = vmatprep.subr.bf16.mxu1 %v1095_v3 }
  0x4c   :  { %826 = vmatpush3.bf16.msra.mxu0 %v954_v25 }
  0x4d   :  { %827 = vmatprep.subr.bf16.mxu0 %v955_v26  ;;  %875 = vmatpush3.bf16.msra.mxu1 %v964_v13  ;;  %v814_v13 = vld [vmem:[#allocation2] ss:$0 sm:$0xff] }
  0x4e   :  { %876 = vmatprep.subr.bf16.mxu1 %v1095_v3 }
  0x50   :  { %828 = vmatpush3.bf16.msra.mxu0 %v956_v28 }
  0x51   :  { %829 = vmatprep.subr.bf16.mxu0 %v957_v29  ;;  %877 = vmatpush3.bf16.msra.mxu1 %v965_v14 }
  0x52   :  { %878 = vmatprep.subr.bf16.mxu1 %v1095_v3 }
  0x54   :  { %830 = vmatpush3.bf16.msra.mxu0 %v958_v30  ;;  %v969_v30 = vld [vmem:[#allocation7 + $0x28] sm:$0xff]  }
  0x55   :  { %884 = vmatprep.subr.bf16.mxu0 %v1095_v3  ;;  %879 = vmatpush3.bf16.msra.mxu1 %v966_v15 }
  0x56   :  { %904 = vmatprep.subr.bf16.mxu1 %v1095_v3 }
  0xb0   :  { %v103_v33 = vpop.permute.xlu0 %102 }
  0xb1   :  { %v123_v34 = vpop.permute.xlu1 %122  ;;  %vm107_vm0 = vcmp.eq.s32.totalorder %v99_v32, %v103_v33  ;;  %vm108_vm1 = vcmp.eq.s32.totalorder %v100_v35, %v103_v33  ;;  %v972_v33 = vld [vmem:[#allocation7 + $0x10] sm:$0xff]  }
  0xb2   :  { %vm127_vm4 = vcmp.eq.s32.totalorder %v99_v32, %v123_v34  ;;  %vm128_vm5 = vcmp.eq.s32.totalorder %v100_v35, %v123_v34  ;;  %v753_v39 = vsel %vm107_vm0, 1.0, %v1095_v3  ;;  %v754_v40 = vsel %vm108_vm1, 1.0, %v1095_v3  ;;  %v973_v34 = vld [vmem:[#allocation7 + $0x8] sm:$0xff]  }
  0xb3   :  { %v757_v43 = vsel %vm127_vm4, 1.0, %v1095_v3  ;;  %v758_v44 = vsel %vm128_vm5, 1.0, %v1095_v3  ;;  %vm1098_vm0 = vmmov 0  }
  0xb4   :  { %v106_v36 = vpop.permute.xlu0 %105  ;;  %v139_v52 = vadd.f32 %v757_v43, %v753_v39  ;;  %v140_v53 = vadd.f32 %v758_v44, %v754_v40  ;;  %880 = vmatprep.mubr.msk.bf16.mxu1 %vm1098_vm0, %v1095_v3 }
  0xb5   :  { %v126_v37 = vpop.permute.xlu1 %125  ;;  %vm109_vm6 = vcmp.eq.s32.totalorder %v99_v32, %v106_v36  ;;  %vm110_vm7 = vcmp.eq.s32.totalorder %v100_v35, %v106_v36  ;;  %v975_v36 = vld [vmem:[#allocation8 + $0x38] sm:$0xff]  }
  0xb6   :  { %vm129_vm2 = vcmp.eq.s32.totalorder %v99_v32, %v126_v37  ;;  %vm130_vm3 = vcmp.eq.s32.totalorder %v100_v35, %v126_v37  ;;  %v755_v46 = vsel %vm109_vm6, 1.0, %v1095_v3  ;;  %v756_v47 = vsel %vm110_vm7, 1.0, %v1095_v3  ;;  %v976_v37 = vld [vmem:[#allocation8 + $0x30] sm:$0xff]  }
  0xb7   :  { %v759_v41 = vsel %vm129_vm2, 1.0, %v1095_v3  ;;  %v760_v42 = vsel %vm130_vm3, 1.0, %v1095_v3 }
  0xb8   :  { %v141_v48 = vadd.f32 %v759_v41, %v755_v46  ;;  %v142_v49 = vadd.f32 %v760_v42, %v756_v47 }
  0xb9   :  { %v147_v38 = vpop.permute.xlu0 %146 }
  0xba   :  { %vm151_vm8 = vcmp.eq.s32.totalorder %v99_v32, %v147_v38  ;;  %vm152_vm9 = vcmp.eq.s32.totalorder %v100_v35, %v147_v38  ;;  %v150_v45 = vpop.permute.xlu1 %149  ;;  %v786_v38 = vld [vmem:[%s1260_s4] ss:$0 sm:$0xff] }
  0xbb   :  { %vm153_vm10 = vcmp.eq.s32.totalorder %v99_v32, %v150_v45  ;;  %vm154_vm11 = vcmp.eq.s32.totalorder %v100_v35, %v150_v45  ;;  %v761_v54 = vsel %vm151_vm8, 1.0, %v1095_v3  ;;  %v762_v55 = vsel %vm152_vm9, 1.0, %v1095_v3 }
  0xbc   :  { %v763_v50 = vsel %vm153_vm10, 1.0, %v1095_v3  ;;  %v764_v51 = vsel %vm154_vm11, 1.0, %v1095_v3  ;;  %v163_v62 = vadd.f32 %v761_v54, %v139_v52  ;;  %v164_v63 = vadd.f32 %v762_v55, %v140_v53  ;;  %v981_v52 = vld [vmem:[#allocation8 + $0x8] sm:$0xff]   ;;  %v982_v53 = vld [vmem:[#allocation8] sm:$0xff]   ;;  %v795_v54 = vld [vmem:[%s1262_s6] ss:$0 sm:$0xff] }
  0xbd   :  { %v165_v57 = vadd.f32 %v763_v50, %v141_v48  ;;  %v166_v58 = vadd.f32 %v764_v51, %v142_v49  ;;  %v977_v48 = vld [vmem:[#allocation8 + $0x28] sm:$0xff]   ;;  %v978_v49 = vld [vmem:[#allocation8 + $0x20] sm:$0xff]   ;;  %v979_v50 = vld [vmem:[#allocation8 + $0x18] sm:$0xff]  }
  0xbe   :  { %v174_v56 = vpop.permute.xlu0 %173  ;;  %v980_v51 = vld [vmem:[#allocation8 + $0x10] sm:$0xff]  }
  0xbf   :  { %vm177_vm12 = vcmp.eq.s32.totalorder %v99_v32, %v174_v56  ;;  %vm178_vm13 = vcmp.eq.s32.totalorder %v100_v35, %v174_v56  ;;  %v171_v61 = vpop.permute.xlu1 %170 }
  0xc0   :  { %v767_v59 = vsel %vm177_vm12, 1.0, %v1095_v3  ;;  %v768_v60 = vsel %vm178_vm13, 1.0, %v1095_v3  ;;  %vm175_vm14 = vcmp.eq.s32.totalorder %v99_v32, %v171_v61  ;;  %vm176_vm15 = vcmp.eq.s32.totalorder %v100_v35, %v171_v61  ;;  %v971_v32 = vld [vmem:[#allocation7 + $0x18] sm:$0xff]   ;;  %v974_v35 = vld [vmem:[#allocation7] sm:$0xff]  }
  0xc1   :  { %v765_v0 = vsel %vm175_vm14, 1.0, %v1095_v3  ;;  %v766_v1 = vsel %vm176_vm15, 1.0, %v1095_v3  ;;  %v189_v2 = vadd.f32 %v767_v59, %v165_v57  ;;  %v190_v6 = vadd.f32 %v768_v60, %v166_v58 }
  0xc2   :  { %v187_v4 = vadd.f32 %v765_v0, %v163_v62  ;;  %v188_v5 = vadd.f32 %v766_v1, %v164_v63 }
  0xc4   :  { %v192_v7 = vpack.c.bf16 %v190_v6, %v188_v5  ;;  %v191_v8 = vpack.c.bf16 %v189_v2, %v187_v4 }
  0xc6   :  { %360 = vmatprep.mubr.bf16.mxu0 %v192_v7 }
  0xc7   :  { %361 = vmatmul.mubr.bf16.vlgmr.msra.gmra.mxu0 %v191_v8 }
  0xc8   :  { %900 = vmatprep.mubr.msk.bf16.mxu0 %vm1098_vm0, %v1095_v3  ;;  %885 = vmatpush3.bf16.msra.mxu0 %v967_v16 }
  0xc9   :  { %886 = vmatprep.subr.bf16.mxu0 %v1095_v3 }
  0xcc   :  { %887 = vmatpush3.bf16.msra.mxu0 %v968_v17 }
  0xcd   :  { %888 = vmatprep.subr.bf16.mxu0 %v1095_v3 }
  0xd0   :  { %889 = vmatpush3.bf16.msra.mxu0 %v969_v30 }
  0xd1   :  { %890 = vmatprep.subr.bf16.mxu0 %v1095_v3 }
  0xd4   :  { %891 = vmatpush3.bf16.msra.mxu0 %v970_v31 }
  0xd5   :  { %892 = vmatprep.subr.bf16.mxu0 %v1095_v3 }
  0xd8   :  { %893 = vmatpush3.bf16.msra.mxu0 %v971_v32 }
  0xd9   :  { %894 = vmatprep.subr.bf16.mxu0 %v1095_v3 }
  0xdc   :  { %895 = vmatpush3.bf16.msra.mxu0 %v972_v33 }
  0xdd   :  { %896 = vmatprep.subr.bf16.mxu0 %v1095_v3 }
  0xe0   :  { %897 = vmatpush3.bf16.msra.mxu0 %v973_v34 }
  0xe1   :  { %898 = vmatprep.subr.bf16.mxu0 %v1095_v3 }
  0xe4   :  { %899 = vmatpush3.bf16.msra.mxu0 %v974_v35 }
 0x187   :  { %v831_v18 = vpop.f32.mrf.mxu0 }
 0x189   :  { %v832_v19 = vpop.f32.mrf.mxu0 }
 0x18a   :  { %v833_v21 = vadd.f32 %v832_v19, %v831_v18 }
 0x18b   :  { %v834_v22 = vpop.f32.mrf.mxu0 }
 0x18c   :  { %v363_v23 = vadd.f32 %v833_v21, %v769_v20 }
 0x18d   :  { %v835_v24 = vpop.f32.mrf.mxu0 }
 0x18e   :  { %v836_v25 = vadd.f32 %v835_v24, %v834_v22  ;;  %983 = vtanh.f32 %v363_v23 }
 0x190   :  { %v366_v26 = vadd.f32 %v836_v25, %v769_v20 }
 0x192   :  { %985 = vtanh.f32 %v366_v26 }
 0x19b   :  { %v984_v27 = vpop.eup %983 }
 0x19f   :  { %v986_v28 = vpop.eup %985 }
 0x1a0   :  { %v371_v29 = vpack.c.bf16 %v986_v28, %v984_v27 }
 0x1a2   :  { %881 = vmatmul.mubr.bf16.vlgmr.msra.gmra.mxu1 %v371_v29 }
 0x1a3   :  { %920 = vmatprep.mubr.msk.bf16.mxu1 %vm1098_vm0, %v1095_v3  ;;  %905 = vmatpush3.bf16.msra.mxu1 %v975_v36 }
 0x1a4   :  { %906 = vmatprep.subr.bf16.mxu1 %v1095_v3 }
 0x1a7   :  { %907 = vmatpush3.bf16.msra.mxu1 %v976_v37 }
 0x1a8   :  { %908 = vmatprep.subr.bf16.mxu1 %v1095_v3 }
 0x1ab   :  { %909 = vmatpush3.bf16.msra.mxu1 %v977_v48 }
 0x1ac   :  { %910 = vmatprep.subr.bf16.mxu1 %v1095_v3 }
 0x1af   :  { %911 = vmatpush3.bf16.msra.mxu1 %v978_v49 }
 0x1b0   :  { %912 = vmatprep.subr.bf16.mxu1 %v1095_v3 }
 0x1b3   :  { %913 = vmatpush3.bf16.msra.mxu1 %v979_v50 }
 0x1b4   :  { %914 = vmatprep.subr.bf16.mxu1 %v1095_v3 }
 0x1b7   :  { %915 = vmatpush3.bf16.msra.mxu1 %v980_v51 }
 0x1b8   :  { %916 = vmatprep.subr.bf16.mxu1 %v1095_v3 }
 0x1bb   :  { %917 = vmatpush3.bf16.msra.mxu1 %v981_v52 }
 0x1bc   :  { %918 = vmatprep.subr.bf16.mxu1 %v1095_v3  ;;  %v804_v3 = vld [vmem:[%s1264_s8] ss:$0 sm:$0xff] }
 0x1bf   :  { %919 = vmatpush3.bf16.msra.mxu1 %v982_v53 }
 0x262   :  { %v477_v39 = vpop.f32.mrf.mxu1 }
 0x263   :  { %v478_v40 = vadd.f32 %v786_v38, %v477_v39 }
 0x264   :  { %v882_v41 = vpop.f32.mrf.mxu1 }
 0x265   :  { %987 = vtanh.f32 %v478_v40 }
 0x266   :  { %v480_v42 = vpop.f32.mrf.mxu1 }
 0x267   :  { %v481_v43 = vadd.f32 %v786_v38, %v480_v42 }
 0x268   :  { %v883_v44 = vpop.f32.mrf.mxu1 }
 0x269   :  { %989 = vtanh.f32 %v481_v43 }
 0x272   :  { %v988_v45 = vpop.eup %987 }
 0x276   :  { %v990_v46 = vpop.eup %989 }
 0x277   :  { %v486_v47 = vpack.c.bf16 %v990_v46, %v988_v45 }
 0x279   :  { %901 = vmatmul.mubr.bf16.vlgmr.msra.gmra.mxu0 %v486_v47 }
 0x339   :  { %v592_v55 = vpop.f32.mrf.mxu0 }
 0x33a   :  { %v593_v56 = vadd.f32 %v795_v54, %v592_v55 }
 0x33b   :  { %v902_v57 = vpop.f32.mrf.mxu0 }
 0x33c   :  { %991 = vtanh.f32 %v593_v56 }
 0x33d   :  { %v595_v58 = vpop.f32.mrf.mxu0 }
 0x33e   :  { %v596_v59 = vadd.f32 %v795_v54, %v595_v58 }
 0x33f   :  { %v903_v60 = vpop.f32.mrf.mxu0 }
 0x340   :  { %993 = vtanh.f32 %v596_v59 }
 0x349   :  { %v992_v61 = vpop.eup %991 }
 0x34d   :  { %v994_v62 = vpop.eup %993 }
 0x34e   :  { %v601_v63 = vpack.c.bf16 %v994_v62, %v992_v61 }
 0x350   :  { %921 = vmatmul.mubr.bf16.vlgmr.msra.gmra.mxu1 %v601_v63 }
 0x410   :  { %v707_v0 = vpop.f32.mrf.mxu1 }
 0x411   :  { %v708_v1 = vadd.f32 %v804_v3, %v707_v0 }
 0x412   :  { %v922_v2 = vpop.f32.mrf.mxu1 }
 0x413   :  { %995 = vtanh.f32 %v708_v1 }
 0x414   :  { %v710_v4 = vpop.f32.mrf.mxu1 }
 0x415   :  { %v711_v5 = vadd.f32 %v804_v3, %v710_v4 }
 0x416   :  { %v923_v6 = vpop.f32.mrf.mxu1 }
 0x417   :  { %997 = vtanh.f32 %v711_v5 }
 0x420   :  { %v996_v7 = vpop.eup %995 }
 0x424   :  { %v998_v8 = vpop.eup %997 }
 0x425   :  { %v716_v9 = vsub.f32 %v996_v7, %v998_v8 }
 0x427   :  { %v717_v11 = vand.u32 2147483647, %v716_v9 }
 0x429   :  { %v725_v12 = vmul.f32 %v813_v10, %v717_v11 }
 0x42b   :  { %726 = vadd.xlane.f32.xlu1 %v725_v12 }
 0x4b4   :  { %v727_v14 = vpop.xlane.xlu1 %726 }
 0x4b5   :  { %v735_v15 = vadd.f32 %v814_v13, %v727_v14 }
 0x4b7   :  { %v736_v16 = vmul.f32 0.5, %v735_v15 }
 0x4b9   :  { %999 = vtanh.f32 %v736_v16 }
 0x4c6   :  { %v1000_v17 = vpop.eup %999 }
 0x4c7   :  { %v738_v18 = vadd.f32 1.0, %v1000_v17 }
 0x4c9   :  { %v739_v19 = vmul.f32 0.5, %v738_v18 }
 0x4cb   :  { %742 = vperm.xlu0 %942, %v739_v19  }
 0x546   :  { %v743_v20 = vpop.permute.xlu0 %742 }
 0x547   :  { %745 = vst [vmem:[%s1267_s11] sm:$0xff] %v743_v20 }
 0x548   :  { %750 = vsyncpa [#allocation4], 1 }
 0x549   :  { %751 = vsyncpa [#allocation6], 1 }
 0x54a   :  { %752 = vsyncpa [#allocation9], 1 }

</bundles_post_ra>
